<compile_context>
chip_gen: v5e
topology: v5e:2x2
jax: 0.10.0
libtpu: 0.0.40
codegen_flags: <defaults>
</compile_context>

<pallas_src>
import functools

import jax
import jax.numpy as jnp
from jax.experimental import pallas as pl
from jax.experimental.pallas import tpu as pltpu

LAYER_SIZES = [2, 64, 64, 64, 1]


def mlp_kernel(xy_ref, w1_ref, b1_ref, w2_ref, b2_ref,
               w3_ref, b3_ref, w4_ref, b4_ref, out_ref):
    # xy_ref: (2, tile_n); weights (out, in); biases (out, 1); b4_ref: (1,1) in SMEM.
    x_row = xy_ref[0:1, :]                     # (1, tile_n)
    y_row = xy_ref[1:2, :]                     # (1, tile_n)

    # Layer 1 (2 -> 64) on the VPU: two broadcast multiply-adds, no MXU.
    h = w1_ref[:, 0:1] * x_row + w1_ref[:, 1:2] * y_row + b1_ref[...]   # (64, tile_n)
    h = jnp.tanh(h)

    # Layers 2/3 (64 -> 64) on the MXU, batch streaming through the free (lane) dim.
    h = jnp.dot(w2_ref[...], h, preferred_element_type=jnp.float32) + b2_ref[...]
    h = jnp.tanh(h)
    h = jnp.dot(w3_ref[...], h, preferred_element_type=jnp.float32) + b3_ref[...]
    h = jnp.tanh(h)

    # Head (64 -> 1); scalar bias from SMEM.
    out = jnp.dot(w4_ref[...], h, preferred_element_type=jnp.float32) + b4_ref[0, 0]
    out_ref[...] = out.astype(out_ref.dtype)   # (1, tile_n) lane-dense store


@functools.partial(jax.jit, static_argnames=("tile_n",))
def mlp_forward(x, y, params, tile_n=512):
    # x, y: (N, 1) float32.  Build xy as (2, N) so batch sits in the lane dimension.
    n = x.shape[0]
    xy = jnp.concatenate([x.T, y.T], axis=0)                 # (2, N)

    # Pad N up to a multiple of tile_n (masked tail handled by slicing afterwards).
    n_pad = ((n + tile_n - 1) // tile_n) * tile_n
    if n_pad != n:
        xy = jnp.pad(xy, ((0, 0), (0, n_pad - n)))

    w1, b1, w2, b2, w3, b3, w4, b4 = params

    def full_spec(shape):
        # Whole (small) parameter tensor resident in VMEM for every grid step.
        return pl.BlockSpec(shape, lambda i: (0, 0))

    grid = (n_pad // tile_n,)
    out_t = pl.pallas_call(
        mlp_kernel,
        out_shape=jax.ShapeDtypeStruct((1, n_pad), jnp.float32),
        grid_spec=pltpu.PrefetchScalarGridSpec(
            num_scalar_prefetch=0,
            grid=grid,
            in_specs=[
                pl.BlockSpec((2, tile_n), lambda i: (0, i)),          # xy tile (lane-dense)
                full_spec(w1.shape), full_spec(b1.shape),
                full_spec(w2.shape), full_spec(b2.shape),
                full_spec(w3.shape), full_spec(b3.shape),
                full_spec(w4.shape),
                pl.BlockSpec(memory_space=pltpu.MemorySpace.SMEM),    # b4 scalar in SMEM
            ],
            out_specs=pl.BlockSpec((1, tile_n), lambda i: (0, i)),    # lane-dense output
        ),
        compiler_params=pltpu.CompilerParams(
            dimension_semantics=("parallel",)),                       # megacore-shardable
    )(xy, w1, b1, w2, b2, w3, b3, w4, b4)

    return out_t[0, :n].reshape(n, 1)


def init_params(key, layer_sizes):
    # Xavier-uniform weights stored as (out, in) (nn.Linear convention), zero biases (out, 1).
    # TODO(synk): torch.manual_seed(42) RNG stream is not reproducible in JAX; same init scheme used.
    params = []
    for i in range(len(layer_sizes) - 1):
        fan_in, fan_out = layer_sizes[i], layer_sizes[i + 1]
        key, sub = jax.random.split(key)
        bound = jnp.sqrt(6.0 / (fan_in + fan_out))
        w = jax.random.uniform(sub, (fan_out, fan_in), jnp.float32,
                               minval=-bound, maxval=bound)
        b = jnp.zeros((fan_out, 1), jnp.float32)
        params.extend([w, b])
    return tuple(params)


def mlp_reference(x, y, params):
    h = jnp.concatenate([x, y], axis=1)        # (N, 2), row-major reference
    w1, b1, w2, b2, w3, b3, w4, b4 = params
    h = jnp.tanh(h @ w1.T + b1.T)
    h = jnp.tanh(h @ w2.T + b2.T)
    h = jnp.tanh(h @ w3.T + b3.T)
    return h @ w4.T + b4.T


if __name__ == "__main__":
    key = jax.random.PRNGKey(0)
    kx, ky, kp = jax.random.split(key, 3)
    params = init_params(kp, LAYER_SIZES)

    # Main check: N divisible by tile_n (grid of 4 steps -> 2 per TC on v7x).
    N = 2048
    x = jax.random.normal(kx, (N, 1), jnp.float32)
    y = jax.random.normal(ky, (N, 1), jnp.float32)
    out = jax.block_until_ready(mlp_forward(x, y, params))
    ref = mlp_reference(x, y, params)
    assert out.shape == (N, 1)
    assert jnp.allclose(out, ref, atol=1e-5, rtol=1e-5), float(jnp.max(jnp.abs(out - ref)))

    # Ragged-batch check: exercises the padding path.
    N2 = 1000
    x2 = jax.random.normal(kx, (N2, 1), jnp.float32)
    y2 = jax.random.normal(ky, (N2, 1), jnp.float32)
    out2 = jax.block_until_ready(mlp_forward(x2, y2, params))
    ref2 = mlp_reference(x2, y2, params)
    assert out2.shape == (N2, 1)
    assert jnp.allclose(out2, ref2, atol=1e-5, rtol=1e-5), float(jnp.max(jnp.abs(out2 - ref2)))

    print("KERNEL_OK")
</pallas_src>

<mosaic_0001>
module attributes {stable_mosaic.version = 11 : i64} {
  func.func @mlp_kernel(%arg0: i32, %arg1: memref<2x512xf32, #tpu.memory_space<vmem>>, %arg2: memref<64x2xf32, #tpu.memory_space<vmem>>, %arg3: memref<64x1xf32, #tpu.memory_space<vmem>>, %arg4: memref<64x64xf32, #tpu.memory_space<vmem>>, %arg5: memref<64x1xf32, #tpu.memory_space<vmem>>, %arg6: memref<64x64xf32, #tpu.memory_space<vmem>>, %arg7: memref<64x1xf32, #tpu.memory_space<vmem>>, %arg8: memref<1x64xf32, #tpu.memory_space<vmem>>, %arg9: memref<1x1xf32, #tpu.memory_space<smem>>, %arg10: memref<1x512xf32, #tpu.memory_space<vmem>>) attributes {dimension_semantics = [#tpu.dimension_semantics<parallel>], iteration_bounds = array<i64: 4>, scalar_prefetch = 0 : i64, scratch_operands = 0 : i64, tpu.core_type = #tpu.core_type<tc>, window_params = [{transform_indices = @transform_0, window_bounds = array<i64: 2, 512>}, {pipeline_mode = #tpu.pipeline_mode<synchronous>, transform_indices = @transform_1, window_bounds = array<i64: 64, 2>}, {pipeline_mode = #tpu.pipeline_mode<synchronous>, transform_indices = @transform_2, window_bounds = array<i64: 64, 1>}, {pipeline_mode = #tpu.pipeline_mode<synchronous>, transform_indices = @transform_3, window_bounds = array<i64: 64, 64>}, {pipeline_mode = #tpu.pipeline_mode<synchronous>, transform_indices = @transform_4, window_bounds = array<i64: 64, 1>}, {pipeline_mode = #tpu.pipeline_mode<synchronous>, transform_indices = @transform_5, window_bounds = array<i64: 64, 64>}, {pipeline_mode = #tpu.pipeline_mode<synchronous>, transform_indices = @transform_6, window_bounds = array<i64: 64, 1>}, {pipeline_mode = #tpu.pipeline_mode<synchronous>, transform_indices = @transform_7, window_bounds = array<i64: 1, 64>}, {transform_indices = @transform_8, window_bounds = array<i64: 1, 1>}, {transform_indices = @transform_9, window_bounds = array<i64: 1, 512>}]} {
    %c0 = arith.constant 0 : index
    %c0_0 = arith.constant 0 : index
    %0 = vector.load %arg1[%c0, %c0_0] : memref<2x512xf32, #tpu.memory_space<vmem>>, vector<1x512xf32>
    %c1 = arith.constant 1 : index
    %c0_1 = arith.constant 0 : index
    %1 = vector.load %arg1[%c1, %c0_1] : memref<2x512xf32, #tpu.memory_space<vmem>>, vector<1x512xf32>
    %c0_2 = arith.constant 0 : index
    %c0_3 = arith.constant 0 : index
    %2 = vector.load %arg2[%c0_2, %c0_3] : memref<64x2xf32, #tpu.memory_space<vmem>>, vector<64x1xf32>
    %3 = vector.broadcast %2 : vector<64x1xf32> to vector<64x512xf32>
    %4 = vector.broadcast %0 : vector<1x512xf32> to vector<64x512xf32>
    %5 = arith.mulf %3, %4 : vector<64x512xf32>
    %c0_4 = arith.constant 0 : index
    %c1_5 = arith.constant 1 : index
    %6 = vector.load %arg2[%c0_4, %c1_5] : memref<64x2xf32, #tpu.memory_space<vmem>>, vector<64x1xf32>
    %7 = vector.broadcast %6 : vector<64x1xf32> to vector<64x512xf32>
    %8 = vector.broadcast %1 : vector<1x512xf32> to vector<64x512xf32>
    %9 = arith.mulf %7, %8 : vector<64x512xf32>
    %10 = arith.addf %5, %9 : vector<64x512xf32>
    %c0_6 = arith.constant 0 : index
    %c0_7 = arith.constant 0 : index
    %11 = vector.load %arg3[%c0_6, %c0_7] : memref<64x1xf32, #tpu.memory_space<vmem>>, vector<64x1xf32>
    %12 = vector.broadcast %11 : vector<64x1xf32> to vector<64x512xf32>
    %13 = arith.addf %10, %12 : vector<64x512xf32>
    %14 = math.tanh %13 : vector<64x512xf32>
    %c0_8 = arith.constant 0 : index
    %c0_9 = arith.constant 0 : index
    %15 = vector.load %arg4[%c0_8, %c0_9] : memref<64x64xf32, #tpu.memory_space<vmem>>, vector<64x64xf32>
    %cst = arith.constant dense<0.000000e+00> : vector<64x512xf32>
    %16 = tpu.matmul %15, %14, %cst {dimension_numbers = #tpu.dot_dimension_numbers<[1], [0], [0], [1], [0, 0, 1, 1], [], []>} : vector<64x64xf32>, vector<64x512xf32>, vector<64x512xf32> -> vector<64x512xf32>
    %c0_10 = arith.constant 0 : index
    %c0_11 = arith.constant 0 : index
    %17 = vector.load %arg5[%c0_10, %c0_11] : memref<64x1xf32, #tpu.memory_space<vmem>>, vector<64x1xf32>
    %18 = vector.broadcast %17 : vector<64x1xf32> to vector<64x512xf32>
    %19 = arith.addf %16, %18 : vector<64x512xf32>
    %20 = math.tanh %19 : vector<64x512xf32>
    %c0_12 = arith.constant 0 : index
    %c0_13 = arith.constant 0 : index
    %21 = vector.load %arg6[%c0_12, %c0_13] : memref<64x64xf32, #tpu.memory_space<vmem>>, vector<64x64xf32>
    %cst_14 = arith.constant dense<0.000000e+00> : vector<64x512xf32>
    %22 = tpu.matmul %21, %20, %cst_14 {dimension_numbers = #tpu.dot_dimension_numbers<[1], [0], [0], [1], [0, 0, 1, 1], [], []>} : vector<64x64xf32>, vector<64x512xf32>, vector<64x512xf32> -> vector<64x512xf32>
    %c0_15 = arith.constant 0 : index
    %c0_16 = arith.constant 0 : index
    %23 = vector.load %arg7[%c0_15, %c0_16] : memref<64x1xf32, #tpu.memory_space<vmem>>, vector<64x1xf32>
    %24 = vector.broadcast %23 : vector<64x1xf32> to vector<64x512xf32>
    %25 = arith.addf %22, %24 : vector<64x512xf32>
    %26 = math.tanh %25 : vector<64x512xf32>
    %c0_17 = arith.constant 0 : index
    %c0_18 = arith.constant 0 : index
    %27 = vector.load %arg8[%c0_17, %c0_18] : memref<1x64xf32, #tpu.memory_space<vmem>>, vector<1x64xf32>
    %cst_19 = arith.constant dense<0.000000e+00> : vector<1x512xf32>
    %28 = tpu.matmul %27, %26, %cst_19 {dimension_numbers = #tpu.dot_dimension_numbers<[1], [0], [0], [1], [0, 0, 1, 1], [], []>} : vector<1x64xf32>, vector<64x512xf32>, vector<1x512xf32> -> vector<1x512xf32>
    %c0_20 = arith.constant 0 : index
    %c0_21 = arith.constant 0 : index
    %29 = memref.load %arg9[%c0_20, %c0_21] : memref<1x1xf32, #tpu.memory_space<smem>>
    %30 = vector.broadcast %29 : f32 to vector<1x512xf32>
    %31 = arith.addf %28, %30 : vector<1x512xf32>
    %c0_22 = arith.constant 0 : index
    %c0_23 = arith.constant 0 : index
    %32 = vector.load %arg10[%c0_22, %c0_23] : memref<1x512xf32, #tpu.memory_space<vmem>>, vector<1x512xf32>
    tpu.vector_store %arg10[%c0_22, %c0_23], %31 {strides = array<i32>} : memref<1x512xf32, #tpu.memory_space<vmem>>, vector<1x512xf32>,
    return
  }
  func.func @transform_0(%arg0: i32) -> (i32, i32) {
    %c0_i32 = arith.constant 0 : i32
    %c0_i32_0 = arith.constant 0 : i32
    return %c0_i32, %arg0 : i32, i32
  }
  func.func @transform_1(%arg0: i32) -> (i32, i32) {
    %c0_i32 = arith.constant 0 : i32
    %c0_i32_0 = arith.constant 0 : i32
    %c0_i32_1 = arith.constant 0 : i32
    return %c0_i32, %c0_i32_0 : i32, i32
  }
  func.func @transform_2(%arg0: i32) -> (i32, i32) {
    %c0_i32 = arith.constant 0 : i32
    %c0_i32_0 = arith.constant 0 : i32
    %c0_i32_1 = arith.constant 0 : i32
    return %c0_i32, %c0_i32_0 : i32, i32
  }
  func.func @transform_3(%arg0: i32) -> (i32, i32) {
    %c0_i32 = arith.constant 0 : i32
    %c0_i32_0 = arith.constant 0 : i32
    %c0_i32_1 = arith.constant 0 : i32
    return %c0_i32, %c0_i32_0 : i32, i32
  }
  func.func @transform_4(%arg0: i32) -> (i32, i32) {
    %c0_i32 = arith.constant 0 : i32
    %c0_i32_0 = arith.constant 0 : i32
    %c0_i32_1 = arith.constant 0 : i32
    return %c0_i32, %c0_i32_0 : i32, i32
  }
  func.func @transform_5(%arg0: i32) -> (i32, i32) {
    %c0_i32 = arith.constant 0 : i32
    %c0_i32_0 = arith.constant 0 : i32
    %c0_i32_1 = arith.constant 0 : i32
    return %c0_i32, %c0_i32_0 : i32, i32
  }
  func.func @transform_6(%arg0: i32) -> (i32, i32) {
    %c0_i32 = arith.constant 0 : i32
    %c0_i32_0 = arith.constant 0 : i32
    %c0_i32_1 = arith.constant 0 : i32
    return %c0_i32, %c0_i32_0 : i32, i32
  }
  func.func @transform_7(%arg0: i32) -> (i32, i32) {
    %c0_i32 = arith.constant 0 : i32
    %c0_i32_0 = arith.constant 0 : i32
    %c0_i32_1 = arith.constant 0 : i32
    return %c0_i32, %c0_i32_0 : i32, i32
  }
  func.func @transform_8(%arg0: i32) -> (i32, i32) {
    %c0_i32 = arith.constant 0 : i32
    %c0_i32_0 = arith.constant 0 : i32
    %c0_i32_1 = arith.constant 0 : i32
    return %c0_i32, %c0_i32_0 : i32, i32
  }
  func.func @transform_9(%arg0: i32) -> (i32, i32) {
    %c0_i32 = arith.constant 0 : i32
    %c0_i32_0 = arith.constant 0 : i32
    return %c0_i32, %arg0 : i32, i32
  }
}

</mosaic_0001>

<bundles_post_ra>
// kernel: mlp_forward.1
= control target key start
LH: loop header
LB: loop body
LE: loop exit
PB: predicated region body
PF: predicated region fallthrough
CT: control target
= control target key end

     0   :  { %s2456_s0 = inlined_call_operand.vmem [shape: f32[2,2048], index: 0, kind: input, shape index: {}]   ;;  %s2457_s1 = inlined_call_operand.vmem [shape: f32[64,2], index: 1, kind: input, shape index: {}]   ;;  %s2458_s2 = inlined_call_operand.vmem [shape: f32[64,1], index: 2, kind: input, shape index: {}]   ;;  %s2459_s3 = inlined_call_operand.vmem [shape: f32[64,64], index: 3, kind: input, shape index: {}]   ;;  %s2460_s4 = inlined_call_operand.vmem [shape: f32[64,1], index: 4, kind: input, shape index: {}]   ;;  %s2461_s5 = inlined_call_operand.vmem [shape: f32[64,64], index: 5, kind: input, shape index: {}]   ;;  %s2462_s6 = inlined_call_operand.vmem [shape: f32[64,1], index: 6, kind: input, shape index: {}]   ;;  %s2463_s7 = inlined_call_operand.vmem [shape: f32[1,64], index: 7, kind: input, shape index: {}]   ;;  %s2464_s8 = inlined_call_operand.<no memory space> [shape: f32[1,1], index: 8, kind: input, shape index: {}]   ;;  %s2465_s9 = inlined_call_operand.hbm [shape: f32[1,2048], index: 9, kind: output, shape index: {}]  }
   0x1   :  { %14 = sst [smem:[#allocation2]] %s2464_s8 }
   0x2   :  { %15 = vsyncpa [#allocation4], 0 }
   0x3   :  { %17 = vsyncpa [#allocation4 + $0x1], 0  ;;  %s1818_s11 = smov 0   ;;  %s1820_s12 = smov 0  }
   0x4   :  { %s1822_s13 = smov 0   ;;  %s1824_s14 = smov 0  }
   0x5 LB: > { %s1376_s8 = sadd.s32 4294967295, %s1761_s14   ;;  %s1377_s15 = sadd.s32 4294967294, %s1761_s14   ;;  %s1761_s14 = sphi %s1824_s14, %s2471_s14   ;;  %s1757_s13 = sphi %s1822_s13, %s2470_s13   ;;  %s1753_s12 = sphi %s1820_s12, %s2469_s12   ;;  %s1749_s11 = sphi %s1818_s11, %s2468_s11  }
   0x6   : > { %s1841_s16 = sadd.s32 1, %s1761_s14   ;;  %s224_s17 = sadd.s32 1, %s1757_s13 }
   0x7   : > { %s221_s18 = ssub.s32 %s1761_s14, %s1841_s16  ;;  %p234_p0 = scmp.ne.s32.totalorder %s1757_s13, %s1753_s12 }
   0x8   : > { %p222_p1 = scmp.eq.s32.totalorder %s221_s18, 0  ;;  %p235_p2 = scmp.eq.s32.totalorder %s1376_s8, 3 }
   0x9   : > { %p240_p3 = scmp.ne.s32.totalorder %s1753_s12, %s1749_s11  ;;  %p241_p4 = scmp.eq.s32.totalorder %s1377_s15, 3 }
   0xa   : > { %s1853_s19 = scalar_select %p222_p1, %s1757_s13, %s224_s17  }
   0xb   : > { %p1855_p5 = por %p235_p2, %p234_p0  ;;  %p1859_p6 = por %p241_p4, %p240_p3 }
   0xc   : > { %p1380_p7 = scmp.ge.s32.totalorder %s1761_s14, 1  ;;  %p292_p8 = scmp.lt.s32.totalorder %s1761_s14, 5 }
   0xe   : > { %p293_p9 = pnand %p1380_p7, %p292_p8 }
   0xf   : > { %s1965_s18 = sshll.u32 (!%p293_p9), %s1376_s8, 2 }
  0x10   : > { %296 = sbr.rel (%p293_p9) target bundleno = 782 (0x30e), region = 56  ;;  %p329_p10 = scmp.lt.s32.totalorder (!%p293_p9), %s1965_s18, 15 }
  0x11   : > { %s1313_s8 = scalar_lea.hbm (!%p293_p9), %s2465_s9, %s1965_s18 }
  0x12   : > { %s1317_s29 = sshll.u32 (!%p293_p9), %s1313_s8, 4  ;;  %s1318_s29 = int_to_ptr.hbm [resolvable:$true] %s1317_s29 }
  0x13   : > { %s1713_s30 = sshra.s32 (!%p293_p9), %s1318_s29, 4  ;;  %s1714_s30 = int_to_ptr.hbm [resolvable:$true] %s1713_s30 }
  0x14   : > { %s1715_s10 = scalar_lea.hbm (!%p293_p9), %s1714_s30, 4  ;;  %p1720_p0 = scmp.lt.s32.totalorder (!%p293_p9), %s1714_s30, %s2465_s9 }
  0x15   : > { %v345_v0 = vld [vmem:[%s2457_s1 + $0x38] sm:$0xff]  ;;  %v344_v1 = vld [vmem:[%s2457_s1 + $0x30] sm:$0xff]  ;;  %v343_v2 = vld [vmem:[%s2457_s1 + $0x28] sm:$0xff]  ;;  %v1763_v3 = vmov 0   ;;  %v1764_v4 = vmov 1   ;;  %s330_s22 = scalar_select %p329_p10, %s1965_s18, 15 }
  0x16   : > { %1502 = vset.pattern.permute.xlu2 %v1763_v3  ;;  %1500 = vset.pattern.permute.xlu1 %v1763_v3  ;;  %v342_v5 = vld [vmem:[%s2457_s1 + $0x20] sm:$0xff]  ;;  %v539_v6 = vld [vmem:[%s2458_s2 + $0x38] sm:$0xff]  ;;  %v538_v8 = vld [vmem:[%s2458_s2 + $0x30] sm:$0xff]  ;;  %vm700_vm0 = vcmask 523264   ;;  %vm1290_vm1 = vcmask 1040384   ;;  %vm1292_vm2 = vcmask 1042434   ;;  %p1716_p11 = scmp.ne.s32.totalorder %s1714_s30, %s1715_s10 }
  0x17   : > { %1498 = vset.pattern.permute.xlu0 %v1763_v3  ;;  %378 = vperm.xlu1 %1500, %v344_v1   ;;  %v341_v7 = vld [vmem:[%s2457_s1 + $0x18] sm:$0xff]  ;;  %v340_v9 = vld [vmem:[%s2457_s1 + $0x10] sm:$0xff]  ;;  %v537_v10 = vld [vmem:[%s2458_s2 + $0x28] sm:$0xff]  ;;  %s1383_s23 = sshll.u32 %s330_s22, 1  ;;  %s1198_s22 = sld [smem:[#allocation2]]  ;;  %vm1294_vm3 = vcmask 1041408  }
  0x18   : > { %383 = vperm.xlu0 %1498, %v345_v0   ;;  %373 = vperm.xlu2 %1502, %v343_v2   ;;  %v339_v11 = vld [vmem:[%s2457_s1 + $0x8] sm:$0xff]  ;;  %v536_v12 = vld [vmem:[%s2458_s2 + $0x20] sm:$0xff]  ;;  %v535_v14 = vld [vmem:[%s2458_s2 + $0x18] sm:$0xff]  ;;  %s332_s26 = scalar_lea.vmem %s2456_s0, %s1383_s23  ;;  %s325_s23 = sand.u32 1, %s1753_s12  }
  0x19   : > { %v338_v13 = vld [vmem:[%s2457_s1] sm:$0xff]  ;;  %v534_v15 = vld [vmem:[%s2458_s2 + $0x10] sm:$0xff]  ;;  %v533_v17 = vld [vmem:[%s2458_s2 + $0x8] sm:$0xff]  ;;  %s1381_s24 = sshll.u32 %s325_s23, 2  ;;  %s1303_s18 = scalar_lea.sflag [#allocation4], %s325_s23 }
  0x1a   : > { %v532_v16 = vld [vmem:[%s2458_s2] sm:$0xff]  ;;  %v659_v18 = vld [vmem:[%s2460_s4 + $0x38] sm:$0xff]  ;;  %v658_v20 = vld [vmem:[%s2460_s4 + $0x30] sm:$0xff]  ;;  %s327_s27 = scalar_lea.vmem [#allocation3], %s1381_s24  ;;  %p1717_p12 = pnand %p1716_p11, %p1855_p5 }
  0x1b   : > { %v655_v19 = vld [vmem:[%s2460_s4 + $0x18] sm:$0xff]  ;;  %v657_v21 = vld [vmem:[%s2460_s4 + $0x28] sm:$0xff]  ;;  %v652_v22 = vld [vmem:[%s2460_s4] sm:$0xff]  ;;  %s1315_s28 = sshll.u32 %s327_s27, 4  ;;  %s1316_s28 = int_to_ptr.vmem [resolvable:$true] %s1315_s28 }
  0x1c   : > { %v656_v23 = vld [vmem:[%s2460_s4 + $0x20] sm:$0xff]  ;;  %v654_v24 = vld [vmem:[%s2460_s4 + $0x10] sm:$0xff]  ;;  %v934_v25 = vld [vmem:[%s2462_s6 + $0x28] sm:$0xff]  ;;  %p1718_p13 = pneg %p1717_p12 }
  0x1d   : > { %v653_v26 = vld [vmem:[%s2460_s4 + $0x8] sm:$0xff]  ;;  %v936_v27 = vld [vmem:[%s2462_s6 + $0x38] sm:$0xff]  ;;  %v931_v28 = vld [vmem:[%s2462_s6 + $0x10] sm:$0xff] }
  0x1e   : > { %v935_v29 = vld [vmem:[%s2462_s6 + $0x30] sm:$0xff]  ;;  %v933_v30 = vld [vmem:[%s2462_s6 + $0x20] sm:$0xff]  ;;  %v932_v31 = vld [vmem:[%s2462_s6 + $0x18] sm:$0xff] }
  0x1f   : > { %1501 = vset.pattern.permute.xlu1 %v1764_v4  ;;  %v930_v33 = vld [vmem:[%s2462_s6 + $0x8] sm:$0xff]  ;;  %v929_v34 = vld [vmem:[%s2462_s6] sm:$0xff] }
  0x20   : > { %1499 = vset.pattern.permute.xlu0 %v1764_v4  ;;  %1503 = vset.pattern.permute.xlu2 %v1764_v4  ;;  %v1384_v39 = vld [vmem:[%s332_s26 + $0x1] ss:$2 sm:$0xf]  ;;  %v335_v40 = vld [vmem:[%s332_s26] ss:$2 sm:$0xf] }
  0x21   : > { %456 = vperm.xlu0 %1499, %v345_v0   ;;  %452 = vperm.xlu1 %1501, %v344_v1   ;;  %v1976_v43 = vperm.slane %v1384_v39, 0  ;;  %v1978_v44 = vperm.slane %v1384_v39, 1  ;;  %v1980_v45 = vperm.slane %v1384_v39, 2  ;;  %v1982_v46 = vperm.slane %v335_v40, 0 }
  0x22   : > { %448 = vperm.xlu2 %1503, %v343_v2   ;;  %v1984_v47 = vperm.slane %v335_v40, 1  ;;  %v1986_v48 = vperm.slane %v1384_v39, 3  ;;  %v1988_v49 = vperm.slane %v335_v40, 2  ;;  %v1995_v54 = vperm.slane %v335_v40, 3 }
  0x29   : > { %1504 = vset.pattern.permute.xlu1 %v1763_v3  ;;  %444 = vperm.xlu0 %1499, %v342_v5  }
  0x2a   : > { %1505 = vset.pattern.permute.xlu2 %v1763_v3  ;;  %577 = vperm.xlu1 %1504, %v539_v6  }
  0x2b   : > { %368 = vperm.xlu2 %1505, %v342_v5  }
  0x31   : > { %440 = vperm.xlu0 %1499, %v341_v7  }
  0x32   : > { %572 = vperm.xlu1 %1504, %v538_v8  }
  0x33   : > { %363 = vperm.xlu2 %1505, %v341_v7  }
  0x39   : > { %436 = vperm.xlu0 %1499, %v340_v9  }
  0x3a   : > { %567 = vperm.xlu1 %1504, %v537_v10  }
  0x3b   : > { %358 = vperm.xlu2 %1505, %v340_v9  }
  0x41   : > { %432 = vperm.xlu0 %1499, %v339_v11  }
  0x42   : > { %562 = vperm.xlu1 %1504, %v536_v12  }
  0x43   : > { %353 = vperm.xlu2 %1505, %v339_v11  }
  0x49   : > { %428 = vperm.xlu0 %1499, %v338_v13  }
  0x4a   : > { %557 = vperm.xlu1 %1504, %v535_v14  }
  0x4b   : > { %348 = vperm.xlu2 %1505, %v338_v13  }
  0x51   : > { %1506 = vset.pattern.permute.xlu0 %v1763_v3 }
  0x52   : > { %552 = vperm.xlu1 %1504, %v534_v15   ;;  %542 = vperm.xlu0 %1506, %v532_v16  }
  0x53   : > { %547 = vperm.xlu2 %1505, %v533_v17  }
  0x5a   : > { %697 = vperm.xlu1 %1504, %v659_v18   ;;  %677 = vperm.xlu0 %1506, %v655_v19  }
  0x5b   : > { %692 = vperm.xlu2 %1505, %v658_v20  }
  0x62   : > { %687 = vperm.xlu1 %1504, %v657_v21   ;;  %662 = vperm.xlu0 %1506, %v652_v22  }
  0x63   : > { %682 = vperm.xlu2 %1505, %v656_v23  }
  0x6a   : > { %672 = vperm.xlu1 %1504, %v654_v24   ;;  %964 = vperm.xlu0 %1506, %v934_v25  }
  0x6b   : > { %667 = vperm.xlu2 %1505, %v653_v26  }
  0x72   : > { %974 = vperm.xlu1 %1504, %v936_v27   ;;  %949 = vperm.xlu0 %1506, %v931_v28   ;;  %v1955_v32 = vpop.permute.xlu2 %373 }
  0x73   : > { %969 = vperm.xlu2 %1505, %v935_v29   ;;  %v415_v26 = vmul.f32 %v1982_v46, %v1955_v32  ;;  %v416_v27 = vmul.f32 %v1984_v47, %v1955_v32  ;;  %v417_v28 = vmul.f32 %v1988_v49, %v1955_v32 }
  0x7a   : > { %959 = vperm.xlu1 %1504, %v933_v30  }
  0x7b   : > { %954 = vperm.xlu2 %1505, %v932_v31  }
  0x7c   : > { %v1967_v35 = vpop.permute.xlu2 %448 }
  0x7d   : > { %v488_v31 = vmul.f32 %v1976_v43, %v1967_v35  ;;  %v491_v39 = vmul.f32 %v1986_v48, %v1967_v35 }
  0x82   : > { %944 = vperm.xlu1 %1504, %v930_v33   ;;  %v489_v33 = vmul.f32 %v1978_v44, %v1967_v35 }
  0x83   : > { %939 = vperm.xlu2 %1505, %v929_v34   ;;  %v490_v34 = vmul.f32 %v1980_v45, %v1967_v35 }
  0x85   : > { %v1971_v38 = vpop.permute.xlu2 %368 }
  0x86   : > { %v411_v35 = vmul.f32 %v1982_v46, %v1971_v38 }
  0x89   : > { %v379_v36 = vpop.permute.xlu1 %378 }
  0x8a   : > { %v384_v37 = vpop.permute.xlu0 %383  ;;  %v419_v10 = vmul.f32 %v1982_v46, %v379_v36  ;;  %v420_v11 = vmul.f32 %v1984_v47, %v379_v36  ;;  %v421_v12 = vmul.f32 %v1988_v49, %v379_v36  ;;  %v422_v14 = vmul.f32 %v1995_v54, %v379_v36 }
  0x8b   : > { %v423_v56 = vmul.f32 %v1982_v46, %v384_v37  ;;  %v424_v57 = vmul.f32 %v1984_v47, %v384_v37  ;;  %v425_v58 = vmul.f32 %v1988_v49, %v384_v37  ;;  %v426_v59 = vmul.f32 %v1995_v54, %v384_v37 }
  0x8c   : > { %v418_v37 = vmul.f32 %v1995_v54, %v1955_v32 }
  0x8d   : > { %v1990_v50 = vpop.permute.xlu2 %363 }
  0x93   : > { %v457_v41 = vpop.permute.xlu0 %456  ;;  %v453_v42 = vpop.permute.xlu1 %452 }
  0x94   : > { %v496_v51 = vmul.f32 %v1976_v43, %v457_v41  ;;  %v497_v52 = vmul.f32 %v1978_v44, %v457_v41  ;;  %v498_v53 = vmul.f32 %v1980_v45, %v457_v41  ;;  %v499_v55 = vmul.f32 %v1986_v48, %v457_v41 }
  0x95   : > { %v492_v6 = vmul.f32 %v1976_v43, %v453_v42  ;;  %v493_v7 = vmul.f32 %v1978_v44, %v453_v42  ;;  %v494_v8 = vmul.f32 %v1980_v45, %v453_v42  ;;  %v495_v9 = vmul.f32 %v1986_v48, %v453_v42  ;;  %v2011_v13 = vpop.permute.xlu2 %358 }
  0x96   : > { %v528_v61 = vadd.f32 %v496_v51, %v423_v56  ;;  %v529_v62 = vadd.f32 %v497_v52, %v424_v57  ;;  %v530_v63 = vadd.f32 %v498_v53, %v425_v58  ;;  %v531_v1 = vadd.f32 %v499_v55, %v426_v59 }
  0x97   : > { %v524_v16 = vadd.f32 %v492_v6, %v419_v10  ;;  %v525_v17 = vadd.f32 %v493_v7, %v420_v11  ;;  %v526_v18 = vadd.f32 %v494_v8, %v421_v12  ;;  %v527_v20 = vadd.f32 %v495_v9, %v422_v14 }
  0x98   : > { %v520_v42 = vadd.f32 %v488_v31, %v415_v26  ;;  %v521_v51 = vadd.f32 %v489_v33, %v416_v27  ;;  %v522_v52 = vadd.f32 %v490_v34, %v417_v28  ;;  %v523_v55 = vadd.f32 %v491_v39, %v418_v37 }
  0x99   : > { %v409_v27 = vmul.f32 %v1988_v49, %v1990_v50  ;;  %v403_v31 = vmul.f32 %v1982_v46, %v2011_v13  ;;  %v404_v34 = vmul.f32 %v1984_v47, %v2011_v13 }
  0x9b   : > { %v2002_v60 = vpop.permute.xlu0 %444 }
  0x9c   : > { %v578_v0 = vpop.permute.xlu1 %577  ;;  %v487_v6 = vmul.f32 %v1986_v48, %v2002_v60 }
  0x9d   : > { %v608_v2 = vadd.f32 %v578_v0, %v528_v61  ;;  %v609_v3 = vadd.f32 %v578_v0, %v529_v62  ;;  %v610_v4 = vadd.f32 %v578_v0, %v530_v63  ;;  %v611_v5 = vadd.f32 %v578_v0, %v531_v1  ;;  %v2032_v40 = vpop.permute.xlu2 %353 }
  0x9e   : > { %v412_v61 = vmul.f32 %v1984_v47, %v1971_v38  ;;  %v413_v62 = vmul.f32 %v1988_v49, %v1971_v38  ;;  %v484_v1 = vmul.f32 %v1976_v43, %v2002_v60 }
  0x9f   : > { %1507 = vtanh.f32 %v608_v2  ;;  %v485_v2 = vmul.f32 %v1978_v44, %v2002_v60 }
  0xa0   : > { %1509 = vtanh.f32 %v609_v3  ;;  %v486_v3 = vmul.f32 %v1980_v45, %v2002_v60  ;;  %v516_v8 = vadd.f32 %v484_v1, %v411_v35  ;;  %v407_v60 = vmul.f32 %v1982_v46, %v1990_v50 }
  0xa1   : > { %1511 = vtanh.f32 %v610_v4  ;;  %v517_v9 = vadd.f32 %v485_v2, %v412_v61 }
  0xa2   : > { %1513 = vtanh.f32 %v611_v5  ;;  %v414_v5 = vmul.f32 %v1995_v54, %v1971_v38  ;;  %v518_v10 = vadd.f32 %v486_v3, %v413_v62 }
  0xa3   : > { %v2014_v15 = vpop.permute.xlu0 %440 }
  0xa4   : > { %v573_v19 = vpop.permute.xlu1 %572  ;;  %v519_v12 = vadd.f32 %v487_v6, %v414_v5  ;;  %v483_v28 = vmul.f32 %v1986_v48, %v2014_v15 }
  0xa5   : > { %v1508_v21 = vpop.eup %1507  ;;  %v604_v22 = vadd.f32 %v573_v19, %v524_v16  ;;  %v605_v23 = vadd.f32 %v573_v19, %v525_v17  ;;  %v606_v24 = vadd.f32 %v573_v19, %v526_v18  ;;  %v607_v29 = vadd.f32 %v573_v19, %v527_v20  ;;  %v2054_v16 = vpop.permute.xlu2 %348 }
  0xa6   : > { %v1510_v25 = vpop.eup %1509  ;;  %733 = vmatpush.msra.mxu0 %v1508_v21  ;;  %v408_v20 = vmul.f32 %v1984_v47, %v1990_v50 }
  0xa7   : > { %v1512_v30 = vpop.eup %1511  ;;  %1515 = vtanh.f32 %v604_v22  ;;  %774 = vmatpush.msra.mxu1 %v1510_v25  ;;  %v482_v25 = vmul.f32 %v1980_v45, %v2014_v15 }
  0xa8   : > { %v1514_v36 = vpop.eup %1513  ;;  %1517 = vtanh.f32 %v605_v23  ;;  %815 = vmatpush.msra.mxu2 %v1512_v30  ;;  %v480_v23 = vmul.f32 %v1976_v43, %v2014_v15  ;;  %v410_v30 = vmul.f32 %v1995_v54, %v1990_v50  ;;  %v400_v50 = vmul.f32 %v1984_v47, %v2032_v40 }
  0xa9   : > { %1519 = vtanh.f32 %v606_v24  ;;  %856 = vmatpush.msra.mxu3 %v1514_v36  ;;  %v481_v24 = vmul.f32 %v1978_v44, %v2014_v15  ;;  %v399_v15 = vmul.f32 %v1982_v46, %v2032_v40 }
  0xaa   : > { %1521 = vtanh.f32 %v607_v29  ;;  %v512_v39 = vadd.f32 %v480_v23, %v407_v60 }
  0xab   : > { %v2034_v41 = vpop.permute.xlu0 %436 }
  0xac   : > { %v568_v53 = vpop.permute.xlu1 %567  ;;  %v477_v5 = vmul.f32 %v1978_v44, %v2034_v41  ;;  %v478_v6 = vmul.f32 %v1980_v45, %v2034_v41 }
  0xad   : > { %v1516_v56 = vpop.eup %1515  ;;  %v600_v57 = vadd.f32 %v568_v53, %v520_v42  ;;  %v601_v32 = vadd.f32 %v568_v53, %v521_v51  ;;  %v602_v58 = vadd.f32 %v568_v53, %v522_v52  ;;  %v603_v63 = vadd.f32 %v568_v53, %v523_v55 }
  0xae   : > { %v1518_v59 = vpop.eup %1517  ;;  %734 = vmatpush.msra.mxu0 %v1516_v56  ;;  %v513_v42 = vadd.f32 %v481_v24, %v408_v20  ;;  %v514_v51 = vadd.f32 %v482_v25, %v409_v27  ;;  %v405_v52 = vmul.f32 %v1988_v49, %v2011_v13  ;;  %v401_v53 = vmul.f32 %v1988_v49, %v2032_v40 }
  0xaf   : > { %v1520_v0 = vpop.eup %1519  ;;  %1523 = vtanh.f32 %v600_v57  ;;  %775 = vmatpush.msra.mxu1 %v1518_v59  ;;  %v515_v57 = vadd.f32 %v483_v28, %v410_v30 }
  0xb0   : > { %v1522_v4 = vpop.eup %1521  ;;  %1525 = vtanh.f32 %v601_v32  ;;  %816 = vmatpush.msra.mxu2 %v1520_v0  ;;  %v402_v0 = vmul.f32 %v1995_v54, %v2032_v40  ;;  %v479_v40 = vmul.f32 %v1986_v48, %v2034_v41 }
  0xb1   : > { %1527 = vtanh.f32 %v602_v58  ;;  %857 = vmatpush.msra.mxu3 %v1522_v4  ;;  %v476_v4 = vmul.f32 %v1976_v43, %v2034_v41 }
  0xb2   : > { %1529 = vtanh.f32 %v603_v63  ;;  %v406_v63 = vmul.f32 %v1995_v54, %v2011_v13 }
  0xb3   : > { %v2052_v7 = vpop.permute.xlu0 %432 }
  0xb4   : > { %v563_v11 = vpop.permute.xlu1 %562  ;;  %v472_v29 = vmul.f32 %v1976_v43, %v2052_v7  ;;  %v473_v33 = vmul.f32 %v1978_v44, %v2052_v7  ;;  %v474_v36 = vmul.f32 %v1980_v45, %v2052_v7  ;;  %v511_v20 = vadd.f32 %v479_v40, %v406_v63  ;;  %v649_v63 = vld [vmem:[%s2459_s3 + $0x28] sm:$0xff] }
  0xb5   : > { %v1524_v14 = vpop.eup %1523  ;;  %v596_v17 = vadd.f32 %v563_v11, %v516_v8  ;;  %v597_v38 = vadd.f32 %v563_v11, %v517_v9  ;;  %v598_v18 = vadd.f32 %v563_v11, %v518_v10  ;;  %v599_v21 = vadd.f32 %v563_v11, %v519_v12  ;;  %v548_v8 = vpop.permute.xlu2 %547 }
  0xb6   : > { %v1526_v19 = vpop.eup %1525  ;;  %735 = vmatpush.msra.mxu0 %v1524_v14  ;;  %v504_v55 = vadd.f32 %v472_v29, %v399_v15  ;;  %v505_v58 = vadd.f32 %v473_v33, %v400_v50  ;;  %v506_v1 = vadd.f32 %v474_v36, %v401_v53  ;;  %v395_v11 = vmul.f32 %v1982_v46, %v2054_v16 }
  0xb7   : > { %v1528_v22 = vpop.eup %1527  ;;  %1531 = vtanh.f32 %v596_v17  ;;  %776 = vmatpush.msra.mxu1 %v1526_v19  ;;  %v396_v12 = vmul.f32 %v1984_v47, %v2054_v16  ;;  %v475_v17 = vmul.f32 %v1986_v48, %v2052_v7  ;;  %v509_v19 = vadd.f32 %v477_v5, %v404_v34 }
  0xb8   : > { %v1530_v26 = vpop.eup %1529  ;;  %1533 = vtanh.f32 %v597_v38  ;;  %817 = vmatpush.msra.mxu2 %v1528_v22  ;;  %v584_v10 = vadd.f32 %v548_v8, %v504_v55  ;;  %v585_v14 = vadd.f32 %v548_v8, %v505_v58  ;;  %v510_v46 = vadd.f32 %v478_v6, %v405_v52 }
  0xb9   : > { %1535 = vtanh.f32 %v598_v18  ;;  %858 = vmatpush.msra.mxu3 %v1530_v26  ;;  %v508_v18 = vadd.f32 %v476_v4, %v403_v31  ;;  %v397_v47 = vmul.f32 %v1988_v49, %v2054_v16  ;;  %v507_v26 = vadd.f32 %v475_v17, %v402_v0  ;;  %v650_v0 = vld [vmem:[%s2459_s3 + $0x30] sm:$0xff] }
  0xba   : > { %1537 = vtanh.f32 %v599_v21  ;;  %v398_v34 = vmul.f32 %v1995_v54, %v2054_v16  ;;  %v644_v16 = vld [vmem:[%s2459_s3] sm:$0xff] }
  0xbb   : > { %v2086_v37 = vpop.permute.xlu0 %428 }
  0xbc   : > { %v558_v56 = vpop.permute.xlu1 %557  ;;  %v468_v9 = vmul.f32 %v1976_v43, %v2086_v37  ;;  %v469_v41 = vmul.f32 %v1978_v44, %v2086_v37  ;;  %v586_v43 = vadd.f32 %v548_v8, %v506_v1  ;;  %v470_v38 = vmul.f32 %v1980_v45, %v2086_v37  ;;  %v651_v1 = vld [vmem:[%s2459_s3 + $0x38] sm:$0xff] }
  0xbd   : > { %v1532_v32 = vpop.eup %1531  ;;  %v592_v59 = vadd.f32 %v558_v56, %v512_v39  ;;  %v593_v35 = vadd.f32 %v558_v56, %v513_v42  ;;  %v594_v61 = vadd.f32 %v558_v56, %v514_v51  ;;  %v595_v2 = vadd.f32 %v558_v56, %v515_v57 }
  0xbe   : > { %v1534_v62 = vpop.eup %1533  ;;  %736 = vmatpush.msra.mxu0 %v1532_v32  ;;  %v500_v22 = vadd.f32 %v468_v9, %v395_v11  ;;  %v501_v45 = vadd.f32 %v469_v41, %v396_v12  ;;  %v471_v49 = vmul.f32 %v1986_v48, %v2086_v37  ;;  %v502_v29 = vadd.f32 %v470_v38, %v397_v47  ;;  %v2192_v41 = vpop.permute.xlu2 %692 }
  0xbf   : > { %v1536_v3 = vpop.eup %1535  ;;  %1539 = vtanh.f32 %v592_v59  ;;  %777 = vmatpush.msra.mxu1 %v1534_v62  ;;  %v587_v48 = vadd.f32 %v548_v8, %v507_v26  ;;  %v645_v59 = vld [vmem:[%s2459_s3 + $0x8] sm:$0xff]  ;;  %v648_v62 = vld [vmem:[%s2459_s3 + $0x20] sm:$0xff] }
  0xc0   : > { %v1538_v13 = vpop.eup %1537  ;;  %1541 = vtanh.f32 %v593_v35  ;;  %818 = vmatpush.msra.mxu2 %v1536_v3  ;;  %v503_v39 = vadd.f32 %v471_v49, %v398_v34  ;;  %v646_v35 = vld [vmem:[%s2459_s3 + $0x10] sm:$0xff] }
  0xc1   : > { %1543 = vtanh.f32 %v594_v61  ;;  %859 = vmatpush.msra.mxu3 %v1538_v13  ;;  %v647_v61 = vld [vmem:[%s2459_s3 + $0x18] sm:$0xff] }
  0xc2   : > { %1545 = vtanh.f32 %v595_v2 }
  0xc3   : > { %1547 = vtanh.f32 %v584_v10 }
  0xc4   : > { %v553_v60 = vpop.permute.xlu1 %552  ;;  %v543_v21 = vpop.permute.xlu0 %542  ;;  %1549 = vtanh.f32 %v585_v14 }
  0xc5   : > { %v1540_v7 = vpop.eup %1539  ;;  %v588_v23 = vadd.f32 %v553_v60, %v508_v18  ;;  %v589_v24 = vadd.f32 %v553_v60, %v509_v19  ;;  %v590_v44 = vadd.f32 %v553_v60, %v510_v46  ;;  %v591_v27 = vadd.f32 %v553_v60, %v511_v20 }
  0xc6   : > { %v1542_v25 = vpop.eup %1541  ;;  %737 = vmatpush.msra.mxu0 %v1540_v7  ;;  %1551 = vtanh.f32 %v586_v43  ;;  %v580_v30 = vadd.f32 %v543_v21, %v500_v22  ;;  %v581_v33 = vadd.f32 %v543_v21, %v501_v45  ;;  %v582_v15 = vadd.f32 %v543_v21, %v502_v29  ;;  %v2202_v60 = vpop.permute.xlu2 %682 }
  0xc7   : > { %v1544_v28 = vpop.eup %1543  ;;  %1553 = vtanh.f32 %v588_v23  ;;  %778 = vmatpush.msra.mxu1 %v1542_v25  ;;  %v583_v51 = vadd.f32 %v543_v21, %v503_v39 }
  0xc8   : > { %v1546_v31 = vpop.eup %1545  ;;  %1555 = vtanh.f32 %v589_v24  ;;  %819 = vmatpush.msra.mxu2 %v1544_v28 }
  0xc9   : > { %1557 = vtanh.f32 %v590_v44  ;;  %860 = vmatpush.msra.mxu3 %v1546_v31  ;;  %v1548_v36 = vpop.eup %1547 }
  0xca   : > { %1559 = vtanh.f32 %v591_v27  ;;  %v1550_v50 = vpop.eup %1549 }
  0xcb   : > { %1561 = vtanh.f32 %v580_v30 }
  0xcc   : > { %v1552_v37 = vpop.eup %1551  ;;  %1563 = vtanh.f32 %v581_v33  ;;  %v2194_v43 = vpop.permute.xlu1 %697 }
  0xcd   : > { %v1554_v42 = vpop.eup %1553  ;;  %1565 = vtanh.f32 %v582_v15  ;;  %v2200_v47 = vpop.permute.xlu0 %677 }
  0xce   : > { %v1556_v52 = vpop.eup %1555  ;;  %738 = vmatpush.msra.mxu0 %v1554_v42  ;;  %1567 = vtanh.f32 %v587_v48  ;;  %v2213_v45 = vpop.permute.xlu2 %667 }
  0xcf   : > { %v1558_v53 = vpop.eup %1557  ;;  %779 = vmatpush.msra.mxu1 %v1556_v52  ;;  %1569 = vtanh.f32 %v583_v51 }
  0xd0   : > { %v1560_v54 = vpop.eup %1559  ;;  %820 = vmatpush.msra.mxu2 %v1558_v53  ;;  %739 = vmatpush.msra.mxu0 %v1548_v36 }
  0xd1   : > { %v1562_v55 = vpop.eup %1561  ;;  %861 = vmatpush.msra.mxu3 %v1560_v54  ;;  %780 = vmatpush.msra.mxu1 %v1550_v50 }
  0xd2   : > { %v1564_v56 = vpop.eup %1563  ;;  %821 = vmatpush.msra.mxu2 %v1552_v37  ;;  %740 = vmatpush.msra.mxu0 %v1562_v55 }
  0xd3   : > { %v1566_v57 = vpop.eup %1565  ;;  %781 = vmatpush.msra.mxu1 %v1564_v56  ;;  %1385 = vmatmul.msk.f32.vlgmr.msra.gmra.mxu0 %vm700_vm0, %v644_v16 }
  0xd4   : > { %822 = vmatpush.msra.mxu2 %v1566_v57  ;;  %1393 = vmatmul.msk.f32.vlgmr.msra.gmra.mxu1 %vm700_vm0, %v644_v16  ;;  %v1568_v32 = vpop.eup %1567  ;;  %v2206_v7 = vpop.permute.xlu1 %687 }
  0xd5   : > { %1401 = vmatmul.msk.f32.vlgmr.msra.gmra.mxu2 %vm700_vm0, %v644_v16  ;;  %862 = vmatpush.msra.mxu3 %v1568_v32  ;;  %v1570_v58 = vpop.eup %1569  ;;  %v2210_v24 = vpop.permute.xlu0 %662 }
  0xd7   : > { %863 = vmatpush.msra.mxu3 %v1570_v58 }
  0xd8   : > { %1409 = vmatmul.msk.f32.vlgmr.msra.gmra.mxu3 %vm700_vm0, %v644_v16 }
  0xdb   : > { %1386 = vmatmul.msk.f32.gmra.mxu0 %vm700_vm0, %v645_v59 }
  0xdc   : > { %1394 = vmatmul.msk.f32.gmra.mxu1 %vm700_vm0, %v645_v59  ;;  %v2217_v29 = vpop.permute.xlu1 %672 }
  0xdd   : > { %1402 = vmatmul.msk.f32.gmra.mxu2 %vm700_vm0, %v645_v59 }
  0xe0   : > { %1410 = vmatmul.msk.f32.gmra.mxu3 %vm700_vm0, %v645_v59 }
  0xe3   : > { %1387 = vmatmul.msk.f32.gmra.mxu0 %vm700_vm0, %v646_v35 }
  0xe4   : > { %1395 = vmatmul.msk.f32.gmra.mxu1 %vm700_vm0, %v646_v35 }
  0xe5   : > { %1403 = vmatmul.msk.f32.gmra.mxu2 %vm700_vm0, %v646_v35 }
  0xe8   : > { %1411 = vmatmul.msk.f32.gmra.mxu3 %vm700_vm0, %v646_v35 }
  0xeb   : > { %1388 = vmatmul.msk.f32.gmra.mxu0 %vm700_vm0, %v647_v61 }
  0xec   : > { %1396 = vmatmul.msk.f32.gmra.mxu1 %vm700_vm0, %v647_v61 }
  0xed   : > { %1404 = vmatmul.msk.f32.gmra.mxu2 %vm700_vm0, %v647_v61 }
  0xf0   : > { %1412 = vmatmul.msk.f32.gmra.mxu3 %vm700_vm0, %v647_v61 }
  0xf3   : > { %1389 = vmatmul.msk.f32.gmra.mxu0 %vm700_vm0, %v648_v62 }
  0xf4   : > { %1397 = vmatmul.msk.f32.gmra.mxu1 %vm700_vm0, %v648_v62 }
  0xf5   : > { %1405 = vmatmul.msk.f32.gmra.mxu2 %vm700_vm0, %v648_v62 }
  0xf8   : > { %1413 = vmatmul.msk.f32.gmra.mxu3 %vm700_vm0, %v648_v62 }
  0xfb   : > { %1390 = vmatmul.msk.f32.gmra.mxu0 %vm700_vm0, %v649_v63 }
  0xfc   : > { %1398 = vmatmul.msk.f32.gmra.mxu1 %vm700_vm0, %v649_v63 }
  0xfd   : > { %1406 = vmatmul.msk.f32.gmra.mxu2 %vm700_vm0, %v649_v63 }
 0x100   : > { %1414 = vmatmul.msk.f32.gmra.mxu3 %vm700_vm0, %v649_v63 }
 0x103   : > { %1391 = vmatmul.msk.f32.gmra.mxu0 %vm700_vm0, %v650_v0 }
 0x104   : > { %1399 = vmatmul.msk.f32.gmra.mxu1 %vm700_vm0, %v650_v0 }
 0x105   : > { %1407 = vmatmul.msk.f32.gmra.mxu2 %vm700_vm0, %v650_v0 }
 0x108   : > { %1415 = vmatmul.msk.f32.gmra.mxu3 %vm700_vm0, %v650_v0 }
 0x10b   : > { %1392 = vmatmul.msk.f32.gmra.mxu0 %vm700_vm0, %v651_v1 }
 0x10c   : > { %1400 = vmatmul.msk.f32.gmra.mxu1 %vm700_vm0, %v651_v1 }
 0x10d   : > { %1408 = vmatmul.msk.f32.gmra.mxu2 %vm700_vm0, %v651_v1 }
 0x110   : > { %1416 = vmatmul.msk.f32.gmra.mxu3 %vm700_vm0, %v651_v1 }
 0x150   : > { %v742_v2 = vpop.f32.mrf.mxu0 }
 0x151   : > { %v783_v3 = vpop.f32.mrf.mxu1  ;;  %v743_v26 = vadd.f32 %v742_v2, %v2210_v24 }
 0x152   : > { %v784_v28 = vadd.f32 %v783_v3, %v2210_v24 }
 0x153   : > { %1571 = vtanh.f32 %v743_v26 }
 0x154   : > { %1573 = vtanh.f32 %v784_v28 }
 0x158   : > { %v2178_v4 = vpop.f32.mrf.mxu2  ;;  %v745_v5 = vpop.f32.mrf.mxu0 }
 0x159   : > { %v786_v6 = vpop.f32.mrf.mxu1  ;;  %v746_v49 = vadd.f32 %v745_v5, %v2213_v45  ;;  %v2226_v51 = vpop.eup %1571 }
 0x15a   : > { %v787_v30 = vadd.f32 %v786_v6, %v2213_v45  ;;  %v2229_v53 = vpop.eup %1573 }
 0x15b   : > { %v2180_v8 = vpop.f32.mrf.mxu3  ;;  %1575 = vtanh.f32 %v746_v49  ;;  %v825_v49 = vadd.f32 %v2178_v4, %v2210_v24  ;;  %v921_v4 = vld [vmem:[%s2461_s5] sm:$0xff] }
 0x15c   : > { %1577 = vtanh.f32 %v787_v30 }
 0x160   : > { %v2182_v13 = vpop.f32.mrf.mxu2  ;;  %v748_v40 = vpop.f32.mrf.mxu0 }
 0x161   : > { %v2184_v9 = vpop.f32.mrf.mxu1  ;;  %v749_v33 = vadd.f32 %v748_v40, %v2217_v29  ;;  %v2232_v55 = vpop.eup %1575  ;;  %v828_v28 = vadd.f32 %v2182_v13, %v2213_v45 }
 0x162   : > { %v2235_v57 = vpop.eup %1577  ;;  %v790_v2 = vadd.f32 %v2184_v9, %v2217_v29 }
 0x163   : > { %v2186_v10 = vpop.f32.mrf.mxu3  ;;  %1579 = vtanh.f32 %v749_v33 }
 0x164   : > { %v869_v13 = vadd.f32 %v2186_v10, %v2213_v45 }
 0x168   : > { %v2188_v11 = vpop.f32.mrf.mxu2  ;;  %v751_v12 = vpop.f32.mrf.mxu0 }
 0x169   : > { %v792_v14 = vpop.f32.mrf.mxu1  ;;  %v752_v34 = vadd.f32 %v751_v12, %v2200_v47  ;;  %v1580_v58 = vpop.eup %1579 }
 0x16a   : > { %v793_v35 = vadd.f32 %v792_v14, %v2200_v47 }
 0x16b   : > { %v2190_v17 = vpop.f32.mrf.mxu3  ;;  %1581 = vtanh.f32 %v752_v34  ;;  %v922_v34 = vld [vmem:[%s2461_s5 + $0x8] sm:$0xff] }
 0x170   : > { %v2196_v38 = vpop.f32.mrf.mxu2  ;;  %v754_v18 = vpop.f32.mrf.mxu0 }
 0x171   : > { %v795_v19 = vpop.f32.mrf.mxu1  ;;  %v755_v15 = vadd.f32 %v754_v18, %v2202_v60  ;;  %v1582_v59 = vpop.eup %1581 }
 0x172   : > { %v796_v32 = vadd.f32 %v795_v19, %v2202_v60 }
 0x173   : > { %v2198_v46 = vpop.f32.mrf.mxu3  ;;  %1583 = vtanh.f32 %v755_v15 }
 0x178   : > { %v2204_v20 = vpop.f32.mrf.mxu2  ;;  %v757_v21 = vpop.f32.mrf.mxu0 }
 0x179   : > { %v798_v22 = vpop.f32.mrf.mxu1  ;;  %v758_v54 = vadd.f32 %v757_v21, %v2206_v7  ;;  %v1584_v62 = vpop.eup %1583  ;;  %v837_v9 = vadd.f32 %v2204_v20, %v2202_v60  ;;  %v831_v20 = vadd.f32 %v2188_v11, %v2217_v29  ;;  %v872_v11 = vadd.f32 %v2190_v17, %v2217_v29 }
 0x17a   : > { %v799_v56 = vadd.f32 %v798_v22, %v2206_v7  ;;  %v866_v29 = vadd.f32 %v2180_v8, %v2210_v24 }
 0x17b   : > { %v2208_v23 = vpop.f32.mrf.mxu3 }
 0x180   : > { %v839_v44 = vpop.f32.mrf.mxu2  ;;  %v760_v25 = vpop.f32.mrf.mxu0 }
 0x181   : > { %v801_v27 = vpop.f32.mrf.mxu1  ;;  %v761_v37 = vadd.f32 %v760_v25, %v2192_v41  ;;  %v840_v6 = vadd.f32 %v839_v44, %v2206_v7  ;;  %v834_v25 = vadd.f32 %v2196_v38, %v2200_v47 }
 0x182   : > { %v802_v52 = vadd.f32 %v801_v27, %v2192_v41  ;;  %v875_v27 = vadd.f32 %v2198_v46, %v2200_v47 }
 0x183   : > { %v880_v31 = vpop.f32.mrf.mxu3 }
 0x184   : > { %v881_v22 = vadd.f32 %v880_v31, %v2206_v7 }
 0x188   : > { %v842_v36 = vpop.f32.mrf.mxu2  ;;  %v763_v50 = vpop.f32.mrf.mxu0 }
 0x189   : > { %v764_v39 = vadd.f32 %v763_v50, %v2194_v43  ;;  %v804_v48 = vpop.f32.mrf.mxu1  ;;  %v843_v63 = vadd.f32 %v842_v36, %v2192_v41  ;;  %v923_v50 = vld [vmem:[%s2461_s5 + $0x10] sm:$0xff] }
 0x18a   : > { %v805_v42 = vadd.f32 %v804_v48, %v2194_v43  ;;  %v925_v48 = vld [vmem:[%s2461_s5 + $0x20] sm:$0xff] }
 0x18b   : > { %v883_v16 = vpop.f32.mrf.mxu3  ;;  %1585 = vtanh.f32 %v764_v39  ;;  %v924_v39 = vld [vmem:[%s2461_s5 + $0x18] sm:$0xff] }
 0x18c   : > { %1587 = vtanh.f32 %v805_v42  ;;  %v884_v14 = vadd.f32 %v883_v16, %v2192_v41  ;;  %v927_v42 = vld [vmem:[%s2461_s5 + $0x30] sm:$0xff] }
 0x18d   : > { %1589 = vtanh.f32 %v761_v37  ;;  %v926_v37 = vld [vmem:[%s2461_s5 + $0x28] sm:$0xff] }
 0x18e   : > { %1591 = vtanh.f32 %v802_v52 }
 0x18f   : > { %1593 = vtanh.f32 %v758_v54 }
 0x190   : > { %v845_v61 = vpop.f32.mrf.mxu2  ;;  %1595 = vtanh.f32 %v799_v56 }
 0x191   : > { %v846_v0 = vadd.f32 %v845_v61, %v2194_v43  ;;  %v1586_v1 = vpop.eup %1585  ;;  %1597 = vtanh.f32 %v796_v32 }
 0x192   : > { %v1588_v3 = vpop.eup %1587  ;;  %1009 = vmatpush.msrb.mxu0 %v1586_v1 }
 0x193   : > { %1599 = vtanh.f32 %v846_v0  ;;  %v1590_v5 = vpop.eup %1589  ;;  %v886_v40 = vpop.f32.mrf.mxu3  ;;  %1050 = vmatpush.msrb.mxu1 %v1588_v3 }
 0x194   : > { %1601 = vtanh.f32 %v793_v35  ;;  %v1592_v12 = vpop.eup %1591  ;;  %v887_v18 = vadd.f32 %v886_v40, %v2194_v43  ;;  %1010 = vmatpush.msrb.mxu0 %v1590_v5  ;;  %v878_v43 = vadd.f32 %v2208_v23, %v2202_v60  ;;  %v2343_v3 = vpop.permute.xlu1 %974 }
 0x195   : > { %1603 = vtanh.f32 %v843_v63  ;;  %v1594_v19 = vpop.eup %1593  ;;  %1051 = vmatpush.msrb.mxu1 %v1592_v12  ;;  %v2339_v63 = vpop.permute.xlu2 %969 }
 0x196   : > { %1605 = vtanh.f32 %v790_v2  ;;  %v1596_v21 = vpop.eup %1595  ;;  %1011 = vmatpush.msrb.mxu0 %v1594_v19 }
 0x197   : > { %1607 = vtanh.f32 %v887_v18  ;;  %v1598_v44 = vpop.eup %1597  ;;  %1052 = vmatpush.msrb.mxu1 %v1596_v21 }
 0x198   : > { %1609 = vtanh.f32 %v840_v6  ;;  %1012 = vmatpush.msrb.mxu0 %v1584_v62 }
 0x199   : > { %v1600_v41 = vpop.eup %1599  ;;  %1611 = vtanh.f32 %v884_v14  ;;  %1053 = vmatpush.msrb.mxu1 %v1598_v44 }
 0x19a   : > { %v1602_v26 = vpop.eup %1601  ;;  %1613 = vtanh.f32 %v837_v9  ;;  %1091 = vmatpush.msrb.mxu2 %v1600_v41  ;;  %1013 = vmatpush.msrb.mxu0 %v1582_v59 }
 0x19b   : > { %v1604_v7 = vpop.eup %1603  ;;  %1615 = vtanh.f32 %v881_v22  ;;  %1054 = vmatpush.msrb.mxu1 %v1602_v26 }
 0x19c   : > { %v1606_v38 = vpop.eup %1605  ;;  %1617 = vtanh.f32 %v834_v25  ;;  %1092 = vmatpush.msrb.mxu2 %v1604_v7  ;;  %1014 = vmatpush.msrb.mxu0 %v1580_v58  ;;  %v2351_v18 = vpop.permute.xlu1 %959 }
 0x19d   : > { %v1608_v60 = vpop.eup %1607  ;;  %1619 = vtanh.f32 %v878_v43  ;;  %1055 = vmatpush.msrb.mxu1 %v1606_v38  ;;  %v2349_v14 = vpop.permute.xlu2 %954 }
 0x19e   : > { %v1610_v23 = vpop.eup %1609  ;;  %1621 = vtanh.f32 %v831_v20  ;;  %1132 = vmatpush.msrb.mxu3 %v1608_v60  ;;  %1015 = vmatpush.msrb.mxu0 %v2232_v55  ;;  %v2363_v20 = vpop.permute.xlu0 %964 }
 0x19f   : > { %v1612_v46 = vpop.eup %1611  ;;  %1623 = vtanh.f32 %v875_v27  ;;  %1093 = vmatpush.msrb.mxu2 %v1610_v23  ;;  %1056 = vmatpush.msrb.mxu1 %v2235_v57 }
 0x1a0   : > { %v1614_v47 = vpop.eup %1613  ;;  %1625 = vtanh.f32 %v828_v28  ;;  %1133 = vmatpush.msrb.mxu3 %v1612_v46  ;;  %1016 = vmatpush.msrb.mxu0 %v2226_v51  ;;  %v928_v51 = vld [vmem:[%s2461_s5 + $0x38] sm:$0xff] }
 0x1a1   : > { %v1616_v17 = vpop.eup %1615  ;;  %1627 = vtanh.f32 %v872_v11  ;;  %1094 = vmatpush.msrb.mxu2 %v1614_v47  ;;  %1057 = vmatpush.msrb.mxu1 %v2229_v53 }
 0x1a2   : > { %v1618_v10 = vpop.eup %1617  ;;  %1629 = vtanh.f32 %v825_v49  ;;  %1134 = vmatpush.msrb.mxu3 %v1616_v17  ;;  %1417 = vmatmul.msk.f32.vlgmr.msrb.gmra.mxu0 %vm700_vm0, %v921_v4 }
 0x1a3   : > { %v1620_v45 = vpop.eup %1619  ;;  %1631 = vtanh.f32 %v869_v13  ;;  %1095 = vmatpush.msrb.mxu2 %v1618_v10  ;;  %1425 = vmatmul.msk.f32.vlgmr.msrb.gmra.mxu1 %vm700_vm0, %v921_v4 }
 0x1a4   : > { %v1622_v30 = vpop.eup %1621  ;;  %1135 = vmatpush.msrb.mxu3 %v1620_v45  ;;  %1633 = vtanh.f32 %v866_v29  ;;  %v2360_v43 = vpop.permute.xlu1 %944 }
 0x1a5   : > { %v1624_v31 = vpop.eup %1623  ;;  %1096 = vmatpush.msrb.mxu2 %v1622_v30  ;;  %v2357_v44 = vpop.permute.xlu2 %939 }
 0x1a6   : > { %v1626_v8 = vpop.eup %1625  ;;  %1136 = vmatpush.msrb.mxu3 %v1624_v31 }
 0x1a7   : > { %v1628_v24 = vpop.eup %1627  ;;  %1097 = vmatpush.msrb.mxu2 %v1626_v8  ;;  %v2381_v8 = vpop.permute.xlu0 %949 }
 0x1a8   : > { %v1630_v33 = vpop.eup %1629  ;;  %1137 = vmatpush.msrb.mxu3 %v1628_v24 }
 0x1a9   : > { %v1632_v15 = vpop.eup %1631  ;;  %1098 = vmatpush.msrb.mxu2 %v1630_v33 }
 0x1aa   : > { %1138 = vmatpush.msrb.mxu3 %v1632_v15  ;;  %1433 = vmatmul.msk.f32.vlgmr.msrb.gmra.mxu2 %vm700_vm0, %v921_v4  ;;  %v1634_v36 = vpop.eup %1633 }
 0x1ab   : > { %1418 = vmatmul.msk.f32.gmra.mxu0 %vm700_vm0, %v922_v34  ;;  %1426 = vmatmul.msk.f32.gmra.mxu1 %vm700_vm0, %v922_v34 }
 0x1ac   : > { %1139 = vmatpush.msrb.mxu3 %v1634_v36 }
 0x1ad   : > { %1441 = vmatmul.msk.f32.vlgmr.msrb.gmra.mxu3 %vm700_vm0, %v921_v4 }
 0x1b2   : > { %1434 = vmatmul.msk.f32.gmra.mxu2 %vm700_vm0, %v922_v34 }
 0x1b3   : > { %1419 = vmatmul.msk.f32.gmra.mxu0 %vm700_vm0, %v923_v50  ;;  %1427 = vmatmul.msk.f32.gmra.mxu1 %vm700_vm0, %v923_v50 }
 0x1b5   : > { %1442 = vmatmul.msk.f32.gmra.mxu3 %vm700_vm0, %v922_v34 }
 0x1ba   : > { %1435 = vmatmul.msk.f32.gmra.mxu2 %vm700_vm0, %v923_v50 }
 0x1bb   : > { %1420 = vmatmul.msk.f32.gmra.mxu0 %vm700_vm0, %v924_v39  ;;  %1428 = vmatmul.msk.f32.gmra.mxu1 %vm700_vm0, %v924_v39 }
 0x1bd   : > { %1443 = vmatmul.msk.f32.gmra.mxu3 %vm700_vm0, %v923_v50 }
 0x1c2   : > { %1436 = vmatmul.msk.f32.gmra.mxu2 %vm700_vm0, %v924_v39 }
 0x1c3   : > { %1421 = vmatmul.msk.f32.gmra.mxu0 %vm700_vm0, %v925_v48  ;;  %1429 = vmatmul.msk.f32.gmra.mxu1 %vm700_vm0, %v925_v48 }
 0x1c5   : > { %1444 = vmatmul.msk.f32.gmra.mxu3 %vm700_vm0, %v924_v39 }
 0x1ca   : > { %1437 = vmatmul.msk.f32.gmra.mxu2 %vm700_vm0, %v925_v48 }
 0x1cb   : > { %1422 = vmatmul.msk.f32.gmra.mxu0 %vm700_vm0, %v926_v37  ;;  %1430 = vmatmul.msk.f32.gmra.mxu1 %vm700_vm0, %v926_v37 }
 0x1cd   : > { %1445 = vmatmul.msk.f32.gmra.mxu3 %vm700_vm0, %v925_v48 }
 0x1d2   : > { %1438 = vmatmul.msk.f32.gmra.mxu2 %vm700_vm0, %v926_v37 }
 0x1d3   : > { %1423 = vmatmul.msk.f32.gmra.mxu0 %vm700_vm0, %v927_v42  ;;  %1431 = vmatmul.msk.f32.gmra.mxu1 %vm700_vm0, %v927_v42 }
 0x1d5   : > { %1446 = vmatmul.msk.f32.gmra.mxu3 %vm700_vm0, %v926_v37 }
 0x1da   : > { %1439 = vmatmul.msk.f32.gmra.mxu2 %vm700_vm0, %v927_v42 }
 0x1db   : > { %1424 = vmatmul.msk.f32.gmra.mxu0 %vm700_vm0, %v928_v51  ;;  %1432 = vmatmul.msk.f32.gmra.mxu1 %vm700_vm0, %v928_v51 }
 0x1dd   : > { %1447 = vmatmul.msk.f32.gmra.mxu3 %vm700_vm0, %v927_v42 }
 0x1e2   : > { %1440 = vmatmul.msk.f32.gmra.mxu2 %vm700_vm0, %v928_v51 }
 0x1e5   : > { %1448 = vmatmul.msk.f32.gmra.mxu3 %vm700_vm0, %v928_v51 }
 0x21f   : > { %v1018_v52 = vpop.f32.mrf.mxu0 }
 0x220   : > { %v1059_v53 = vpop.f32.mrf.mxu1  ;;  %v1019_v25 = vadd.f32 %v1018_v52, %v2357_v44 }
 0x221   : > { %v1060_v26 = vadd.f32 %v1059_v53, %v2357_v44 }
 0x222   : > { %1635 = vtanh.f32 %v1019_v25 }
 0x223   : > { %1637 = vtanh.f32 %v1060_v26 }
 0x228   : > { %v1021_v54 = vpop.f32.mrf.mxu0  ;;  %v2327_v16 = vpop.f32.mrf.mxu1 }
 0x229   : > { %v1022_v7 = vadd.f32 %v1021_v54, %v2360_v43  ;;  %v2375_v17 = vpop.eup %1635  ;;  %v1063_v48 = vadd.f32 %v2327_v16, %v2360_v43 }
 0x22a   : > { %v2378_v10 = vpop.eup %1637 }
 0x22b   : > { %1639 = vtanh.f32 %v1022_v7 }
 0x22d   : > { %v2329_v55 = vpop.f32.mrf.mxu2 }
 0x230   : > { %v2331_v56 = vpop.f32.mrf.mxu3  ;;  %v1024_v57 = vpop.f32.mrf.mxu0 }
 0x231   : > { %v1065_v32 = vpop.f32.mrf.mxu1  ;;  %v1640_v31 = vpop.eup %1639  ;;  %v1025_v34 = vadd.f32 %v1024_v57, %v2381_v8 }
 0x232   : > { %v1066_v36 = vadd.f32 %v1065_v32, %v2381_v8 }
 0x235   : > { %v2333_v58 = vpop.f32.mrf.mxu2 }
 0x238   : > { %v2335_v59 = vpop.f32.mrf.mxu3  ;;  %v1027_v35 = vpop.f32.mrf.mxu0 }
 0x239   : > { %v1068_v61 = vpop.f32.mrf.mxu1  ;;  %v1028_v45 = vadd.f32 %v1027_v35, %v2349_v14 }
 0x23a   : > { %v1069_v24 = vadd.f32 %v1068_v61, %v2349_v14 }
 0x23d   : > { %v2337_v62 = vpop.f32.mrf.mxu2 }
 0x23e   : > { %v1107_v25 = vadd.f32 %v2337_v62, %v2381_v8 }
 0x240   : > { %v2341_v0 = vpop.f32.mrf.mxu3  ;;  %v1030_v1 = vpop.f32.mrf.mxu0 }
 0x241   : > { %v1071_v2 = vpop.f32.mrf.mxu1  ;;  %v1031_v4 = vadd.f32 %v1030_v1, %v2351_v18 }
 0x242   : > { %v1072_v29 = vadd.f32 %v1071_v2, %v2351_v18 }
 0x245   : > { %v2345_v5 = vpop.f32.mrf.mxu2 }
 0x248   : > { %v2347_v6 = vpop.f32.mrf.mxu3  ;;  %v1033_v40 = vpop.f32.mrf.mxu0 }
 0x249   : > { %v1074_v12 = vpop.f32.mrf.mxu1  ;;  %v1034_v46 = vadd.f32 %v1033_v40, %v2363_v20  ;;  %v1151_v26 = vadd.f32 %v2347_v6, %v2349_v14  ;;  %v1101_v6 = vadd.f32 %v2329_v55, %v2357_v44 }
 0x24a   : > { %v1075_v13 = vadd.f32 %v1074_v12, %v2363_v20 }
 0x24d   : > { %v2353_v19 = vpop.f32.mrf.mxu2 }
 0x24e   : > { %v1113_v2 = vadd.f32 %v2353_v19, %v2351_v18 }
 0x250   : > { %v2355_v9 = vpop.f32.mrf.mxu3  ;;  %v1036_v21 = vpop.f32.mrf.mxu0 }
 0x251   : > { %v1077_v22 = vpop.f32.mrf.mxu1  ;;  %v1037_v11 = vadd.f32 %v1036_v21, %v2339_v63 }
 0x252   : > { %v1078_v49 = vadd.f32 %v1077_v22, %v2339_v63  ;;  %v1110_v22 = vadd.f32 %v2345_v5, %v2349_v14 }
 0x255   : > { %v1115_v41 = vpop.f32.mrf.mxu2 }
 0x256   : > { %v1116_v57 = vadd.f32 %v1115_v41, %v2363_v20 }
 0x258   : > { %v2366_v27 = vpop.f32.mrf.mxu3  ;;  %v1039_v38 = vpop.f32.mrf.mxu0 }
 0x259   : > { %v1040_v28 = vadd.f32 %v1039_v38, %v2343_v3  ;;  %v1080_v60 = vpop.f32.mrf.mxu1  ;;  %v1157_v12 = vadd.f32 %v2366_v27, %v2363_v20  ;;  %v1104_v20 = vadd.f32 %v2333_v58, %v2360_v43  ;;  %v1197_v58 = vld [vmem:[%s2463_s7] sm:$0x1]  ;;  %v1142_v27 = vadd.f32 %v2331_v56, %v2357_v44 }
 0x25a   : > { %v1081_v23 = vadd.f32 %v1080_v60, %v2343_v3 }
 0x25b   : > { %1641 = vtanh.f32 %v1040_v28 }
 0x25c   : > { %1643 = vtanh.f32 %v1081_v23 }
 0x25d   : > { %v1118_v47 = vpop.f32.mrf.mxu2  ;;  %1645 = vtanh.f32 %v1037_v11 }
 0x25e   : > { %1647 = vtanh.f32 %v1078_v49  ;;  %v1119_v51 = vadd.f32 %v1118_v47, %v2339_v63  ;;  %v1199_v49 = vstv %s1198_s22  ;;  %s1719_s22 = scalar_lea.hbm %s2465_s9, 16 }
 0x25f   : > { %1649 = vtanh.f32 %v1034_v46  ;;  %p1721_p1 = scmp.lt.s32.totalorder %s1719_s22, %s1715_s10 }
 0x260   : > { %v1159_v30 = vpop.f32.mrf.mxu3  ;;  %1651 = vtanh.f32 %v1075_v13 }
 0x261   : > { %v1642_v33 = vpop.eup %1641  ;;  %1653 = vtanh.f32 %v1031_v4  ;;  %v1160_v35 = vadd.f32 %v1159_v30, %v2339_v63  ;;  %v1297_v30 = vlaneseq  ;;  %p1722_p2 = por %p1721_p1, %p1720_p0 }
 0x262   : > { %v1644_v15 = vpop.eup %1643  ;;  %1655 = vtanh.f32 %v1072_v29  ;;  %1211 = vmatpush.msra.mxu0 %v1642_v33 }
 0x263   : > { %v1646_v50 = vpop.eup %1645  ;;  %1657 = vtanh.f32 %v1028_v45  ;;  %1231 = vmatpush.msra.mxu1 %v1644_v15  ;;  %vm1299_vm4 = vcmp.lt.s32.totalorder %v1297_v30, 512  ;;  %p1723_p3 = pnand %p1722_p2, %p1718_p13 }
 0x264   : > { %v1648_v39 = vpop.eup %1647  ;;  %1659 = vtanh.f32 %v1069_v24  ;;  %1212 = vmatpush.msra.mxu0 %v1646_v50 }
 0x265   : > { %v1121_v37 = vpop.f32.mrf.mxu2  ;;  %v1650_v42 = vpop.eup %1649  ;;  %1661 = vtanh.f32 %v1025_v34  ;;  %1232 = vmatpush.msra.mxu1 %v1648_v39 }
 0x266   : > { %v1122_v52 = vadd.f32 %v1121_v37, %v2343_v3  ;;  %v1652_v53 = vpop.eup %1651  ;;  %1663 = vtanh.f32 %v1066_v36  ;;  %1213 = vmatpush.msra.mxu0 %v1650_v42 }
 0x267   : > { %v1654_v54 = vpop.eup %1653  ;;  %1233 = vmatpush.msra.mxu1 %v1652_v53 }
 0x268   : > { %1665 = vtanh.f32 %v1122_v52  ;;  %v1162_v32 = vpop.f32.mrf.mxu3  ;;  %v1656_v16 = vpop.eup %1655  ;;  %1214 = vmatpush.msra.mxu0 %v1654_v54 }
 0x269   : > { %1667 = vtanh.f32 %v1063_v48  ;;  %v1163_v61 = vadd.f32 %v1162_v32, %v2343_v3  ;;  %v1658_v1 = vpop.eup %1657  ;;  %1234 = vmatpush.msra.mxu1 %v1656_v16  ;;  %v1154_v3 = vadd.f32 %v2355_v9, %v2351_v18  ;;  %v1148_v9 = vadd.f32 %v2341_v0, %v2381_v8 }
 0x26a   : > { %1669 = vtanh.f32 %v1119_v51  ;;  %v1660_v40 = vpop.eup %1659  ;;  %1215 = vmatpush.msra.mxu0 %v1658_v1  ;;  %v1145_v0 = vadd.f32 %v2335_v59, %v2360_v43 }
 0x26b   : > { %1671 = vtanh.f32 %v1163_v61  ;;  %v1662_v21 = vpop.eup %1661  ;;  %1235 = vmatpush.msra.mxu1 %v1660_v40 }
 0x26c   : > { %1673 = vtanh.f32 %v1116_v57  ;;  %v1664_v63 = vpop.eup %1663  ;;  %1216 = vmatpush.msra.mxu0 %v1662_v21 }
 0x26d   : > { %1675 = vtanh.f32 %v1160_v35  ;;  %1236 = vmatpush.msra.mxu1 %v1664_v63 }
 0x26e   : > { %v1666_v19 = vpop.eup %1665  ;;  %1677 = vtanh.f32 %v1113_v2  ;;  %1217 = vmatpush.msra.mxu0 %v1640_v31 }
 0x26f   : > { %v1668_v41 = vpop.eup %1667  ;;  %1679 = vtanh.f32 %v1157_v12  ;;  %1251 = vmatpush.msra.mxu2 %v1666_v19 }
 0x270   : > { %v1670_v5 = vpop.eup %1669  ;;  %1681 = vtanh.f32 %v1110_v22  ;;  %1237 = vmatpush.msra.mxu1 %v1668_v41  ;;  %1218 = vmatpush.msra.mxu0 %v2375_v17 }
 0x271   : > { %v1672_v18 = vpop.eup %1671  ;;  %1683 = vtanh.f32 %v1154_v3  ;;  %1252 = vmatpush.msra.mxu2 %v1670_v5  ;;  %1449 = vmatmul.msk.f32.vlgmr.msra.gmra.mxu0 %vm700_vm0, %v1197_v58 }
 0x272   : > { %v1674_v62 = vpop.eup %1673  ;;  %1685 = vtanh.f32 %v1107_v25  ;;  %1271 = vmatpush.msra.mxu3 %v1672_v18  ;;  %1238 = vmatpush.msra.mxu1 %v2378_v10 }
 0x273   : > { %v1676_v14 = vpop.eup %1675  ;;  %1687 = vtanh.f32 %v1151_v26  ;;  %1253 = vmatpush.msra.mxu2 %v1674_v62  ;;  %1450 = vmatmul.msk.f32.vlgmr.msra.gmra.mxu1 %vm700_vm0, %v1197_v58 }
 0x274   : > { %v1678_v7 = vpop.eup %1677  ;;  %1689 = vtanh.f32 %v1104_v20  ;;  %1272 = vmatpush.msra.mxu3 %v1676_v14 }
 0x275   : > { %v1680_v55 = vpop.eup %1679  ;;  %1691 = vtanh.f32 %v1148_v9  ;;  %1254 = vmatpush.msra.mxu2 %v1678_v7 }
 0x276   : > { %v1682_v38 = vpop.eup %1681  ;;  %1693 = vtanh.f32 %v1101_v6  ;;  %1273 = vmatpush.msra.mxu3 %v1680_v55 }
 0x277   : > { %v1684_v28 = vpop.eup %1683  ;;  %1695 = vtanh.f32 %v1145_v0  ;;  %1255 = vmatpush.msra.mxu2 %v1682_v38 }
 0x278   : > { %v1686_v59 = vpop.eup %1685  ;;  %1274 = vmatpush.msra.mxu3 %v1684_v28  ;;  %1697 = vtanh.f32 %v1142_v27 }
 0x279   : > { %v1688_v43 = vpop.eup %1687  ;;  %1256 = vmatpush.msra.mxu2 %v1686_v59 }
 0x27a   : > { %v1690_v60 = vpop.eup %1689  ;;  %1275 = vmatpush.msra.mxu3 %v1688_v43 }
 0x27b   : > { %v1692_v11 = vpop.eup %1691  ;;  %1257 = vmatpush.msra.mxu2 %v1690_v60 }
 0x27c   : > { %v1694_v23 = vpop.eup %1693  ;;  %1276 = vmatpush.msra.mxu3 %v1692_v11 }
 0x27d   : > { %v1696_v56 = vpop.eup %1695  ;;  %1258 = vmatpush.msra.mxu2 %v1694_v23 }
 0x27e   : > { %1277 = vmatpush.msra.mxu3 %v1696_v56  ;;  %1451 = vmatmul.msk.f32.vlgmr.msra.gmra.mxu2 %vm700_vm0, %v1197_v58  ;;  %v1698_v44 = vpop.eup %1697 }
 0x280   : > { %1278 = vmatpush.msra.mxu3 %v1698_v44 }
 0x281   : > { %1452 = vmatmul.msk.f32.vlgmr.msra.gmra.mxu3 %vm700_vm0, %v1197_v58 }
 0x2ee   : > { %v1220_v47 = vpop.f32.mrf.mxu0 }
 0x2ef   : > { %v1221_v10 = vadd.f32 %v1220_v47, %v1199_v49 }
 0x2f0   : > { %v1240_v46 = vpop.f32.mrf.mxu1 }
 0x2f1   : > { %v1241_v13 = vadd.f32 %v1240_v46, %v1199_v49 }
 0x2f3   : > { %v1287_v29 = vrot.slane %v1241_v13, 7 }
 0x2f5   : > { %v1291_v33 = vsel %vm1290_vm1, %v1221_v10, %v1287_v29 }
 0x301   : > { %v1260_v4 = vpop.f32.mrf.mxu2 }
 0x302   : > { %v1261_v17 = vadd.f32 %v1260_v4, %v1199_v49 }
 0x304   : > { %v1280_v45 = vpop.f32.mrf.mxu3  ;;  %v1288_v31 = vrot.slane %v1261_v17, 6 }
 0x305   : > { %v1281_v8 = vadd.f32 %v1280_v45, %v1199_v49 }
 0x307   : > { %v1289_v24 = vrot.slane %v1281_v8, 5 }
 0x309   : > { %v1293_v34 = vsel %vm1292_vm2, %v1288_v31, %v1289_v24 }
 0x30a   : > { %v1295_v15 = vsel %vm1294_vm3, %v1291_v33, %v1293_v34 }
 0x30b   : > { %1301 = vst.msk [vmem:[%s327_s27] sm:$0xf] %vm1299_vm4, %v1295_v15 }
 0x30c   : > { %1726 = shalt.err (!%p1723_p3)
}
 0x30d   : > { %1457 = dma.vmem_to_hbm [thread:$0]  (%p1855_p5), %s1316_s28, 64, %s1318_s29, %s1303_s18  }
 0x30e PF: > { %p1463_p4 = scmp.ge.s32.totalorder %s1761_s14, 2  ;;  %s1329_s23 = sand.u32 1, %s1749_s11  }
 0x30f   : > { %s1330_s26 = scalar_lea.sflag [#allocation4], %s1329_s23 }
 0x310   : > { %p1460_p7 = pnand %p1463_p4, %p1859_p6 }
 0x312   : > { %p1461_p8 = pneg %p1460_p7 }
 0x314   : > { %1744 = dma.done.wait (%p1461_p8), %s1330_s26, 64  }
 0x315   : > { %1746 = vsyncadd (%p1461_p8), %s1330_s26, 4294967232  ;;  %p20_p9 = scmp.ge.s32.totalorder %s1841_s16, 6   ;;  %s2468_s11 = smov %s1753_s12 }
 0x316   : > { %s2469_s12 = smov %s1757_s13  ;;  %s2470_s13 = smov %s1853_s19 }
 0x317   : > { %s2471_s14 = smov %s1841_s16  ;;  %22 = sbr.rel (!%p20_p9) target bundleno = 5 (0x5), region = 92 }
 0x31c   :  { %1336 = vsyncpa [#allocation4], 1 }
 0x31d   :  { %1338 = vsyncpa [#allocation4 + $0x1], 1 }

</bundles_post_ra>
